<compile_context>
chip_gen: v7x
topology: tpu7x:2x2x1
jax: 0.10.0
libtpu: 0.0.40
codegen_flags: <defaults>
</compile_context>

<pallas_src>
import functools

import jax
import jax.numpy as jnp
from jax import lax
from jax.experimental import pallas as pl
from jax.experimental.pallas import tpu as pltpu

_SQRT2_INV = 0.7071067811865475


def _gelu_exact(x):
    # Matches torch.nn.GELU() default (erf-based, non-approximate).
    return 0.5 * x * (1.0 + lax.erf(x * _SQRT2_INV))


def _adapter_kernel(x_ref, w1_ref, b1_ref, w2_ref, b2_ref, o_ref, *,
                    skip, skip_scale):
    cdt = w1_ref.dtype                                  # compute dtype (bf16 or f32)
    x = x_ref[...]                                      # (TM, D), native dtype
    # fc1 (f32 accumulate on MXU) + exact GELU in f32 (VPU/EUP).
    h = jnp.dot(x.astype(cdt), w1_ref[...], preferred_element_type=jnp.float32)
    h = _gelu_exact(h + b1_ref[...])
    # fc2; `scale` already folded into w2/b2 by the wrapper.
    y = jnp.dot(h.astype(cdt), w2_ref[...], preferred_element_type=jnp.float32)
    y = y + b2_ref[...]
    if skip:                                            # static python flag
        y = y + skip_scale * x.astype(jnp.float32)
    o_ref[...] = y.astype(o_ref.dtype)


def _resident_spec(shape, single_buffer):
    """Constant-index operand: resident in VMEM across the whole grid."""
    idx = lambda i: (0, 0)
    if single_buffer:
        try:
            return pl.BlockSpec(shape, idx, pipeline_mode=pl.Buffered(1))
        except (AttributeError, TypeError):
            pass
    return pl.BlockSpec(shape, idx)


def adapter_forward(x, params, *, skip=False, scale=1.0, block_m=512):
    """Pallas implementation of Adapter.forward.

    x: (..., D) array (bf16 or f32; output keeps x.dtype).
    params: dict with w1 (D, Hd), b1 (Hd,), w2 (Hd, D), b2 (D,).
    """
    orig_shape = x.shape
    D = orig_shape[-1]
    x2 = x.reshape(-1, D)                       # native dtype, no extra HBM pass
    M = x2.shape[0]
    out_dtype = x.dtype

    # bf16 activations -> bf16 weights on the MXU (f32 accumulate); else f32.
    compute_dtype = jnp.bfloat16 if x.dtype == jnp.bfloat16 else jnp.float32

    w1, b1, w2, b2 = params["w1"], params["b1"], params["w2"], params["b2"]
    Hd = w1.shape[1]
    # Zero-pad hidden dim to a lane-dense multiple of 128 (numerically exact).
    Hd_pad = ((Hd + 127) // 128) * 128
    if Hd_pad != Hd:
        w1 = jnp.pad(w1, ((0, 0), (0, Hd_pad - Hd)))
        b1 = jnp.pad(b1, ((0, Hd_pad - Hd),))
        w2 = jnp.pad(w2, ((0, Hd_pad - Hd), (0, 0)))
    w1 = w1.astype(compute_dtype)                                   # (D, Hd_pad)
    w2 = (w2.astype(jnp.float32) * scale).astype(compute_dtype)     # (Hd_pad, D)
    b1 = b1.reshape(1, -1).astype(jnp.float32)                      # (1, Hd_pad)
    b2 = (b2.astype(jnp.float32) * scale).reshape(1, -1)            # (1, D)

    # Token tile: multiple of 8 rows, <= block_m; keep >= 2 grid steps so both
    # v7x TensorCores get work for small M.
    tm = min(block_m, ((M + 7) // 8) * 8)
    if M > 8:
        tm = min(tm, ((pl.cdiv(M, 2) + 7) // 8) * 8)
    tm = max(8, (tm // 8) * 8)
    grid_m = pl.cdiv(M, tm)

    # VMEM budget: resident weights/biases + pipelined x/out tiles (+ headroom).
    w_bytes = ((w1.size + w2.size) * jnp.dtype(compute_dtype).itemsize
               + (b1.size + b2.size) * 4)
    tile_bytes = tm * D * (jnp.dtype(x2.dtype).itemsize
                           + jnp.dtype(out_dtype).itemsize)
    vmem_limit = int(min(128 << 20,
                         max(32 << 20, 2 * w_bytes + 4 * tile_bytes + (8 << 20))))

    kern = functools.partial(_adapter_kernel, skip=bool(skip),
                             skip_scale=float(scale))

    def _call(single_buffer_weights):
        return pl.pallas_call(
            kern,
            out_shape=jax.ShapeDtypeStruct((M, D), out_dtype),
            grid=(grid_m,),
            in_specs=[
                pl.BlockSpec((tm, D), lambda i: (i, 0)),                 # x tile
                _resident_spec((D, Hd_pad), single_buffer_weights),      # w1
                _resident_spec((1, Hd_pad), single_buffer_weights),      # b1
                _resident_spec((Hd_pad, D), single_buffer_weights),      # w2*scale
                _resident_spec((1, D), single_buffer_weights),           # b2*scale
            ],
            out_specs=pl.BlockSpec((tm, D), lambda i: (i, 0)),
            compiler_params=pltpu.CompilerParams(
                dimension_semantics=("parallel",),
                vmem_limit_bytes=vmem_limit),
        )(x2, w1, b1, w2, b2)

    try:
        out = _call(True)
    except Exception:
        # pl.Buffered(1) not supported by this jax/libtpu -> default buffering.
        out = _call(False)

    return out.reshape(orig_shape)


def init_adapter_params(key, embedding_dim, mlp_ratio=0.25):
    """PyTorch nn.Linear-style init (uniform +-1/sqrt(fan_in))."""
    hidden = int(embedding_dim * mlp_ratio)
    k1, k2, k3, k4 = jax.random.split(key, 4)
    bd1 = 1.0 / (embedding_dim ** 0.5)
    w1 = jax.random.uniform(k1, (embedding_dim, hidden), jnp.float32, -bd1, bd1)
    b1 = jax.random.uniform(k2, (hidden,), jnp.float32, -bd1, bd1)
    bd2 = 1.0 / (hidden ** 0.5)
    w2 = jax.random.uniform(k3, (hidden, embedding_dim), jnp.float32, -bd2, bd2)
    b2 = jax.random.uniform(k4, (embedding_dim,), jnp.float32, -bd2, bd2)
    return dict(w1=w1, b1=b1, w2=w2, b2=b2)


def adapter_reference(x, params, *, skip=False, scale=1.0):
    """Pure-JAX reference matching the PyTorch Adapter.forward."""
    x = x.astype(jnp.float32)
    h = _gelu_exact(x @ params["w1"] + params["b1"])
    out = h @ params["w2"] + params["b2"]
    if skip:
        out = out + x
    return scale * out


if __name__ == "__main__":
    key = jax.random.PRNGKey(0)
    kx, kp = jax.random.split(key)

    # Shapes implied by the module: embedding_dim=128, mlp_ratio=0.25 -> Hd=32.
    B, S, D = 2, 16, 128
    skip, scale = True, 0.5

    x = jax.random.normal(kx, (B, S, D), jnp.float32)
    params = init_adapter_params(kp, D, mlp_ratio=0.25)
    ref = adapter_reference(x, params, skip=skip, scale=scale)

    # f32 path: exact-erf GELU, should match the reference tightly.
    out = jax.block_until_ready(adapter_forward(x, params, skip=skip, scale=scale))
    assert out.shape == (B, S, D) and out.dtype == x.dtype
    assert jnp.allclose(out, ref, atol=1e-5, rtol=1e-5), "f32 mismatch vs reference"

    # bf16 path: native-dtype activations + bf16 MXU (f32 accumulation).
    xb = x.astype(jnp.bfloat16)
    outb = jax.block_until_ready(adapter_forward(xb, params, skip=skip, scale=scale))
    assert outb.shape == (B, S, D) and outb.dtype == jnp.bfloat16
    assert float(jnp.max(jnp.abs(outb.astype(jnp.float32) - ref))) < 0.1, \
        "bf16 mismatch vs reference"

    print("KERNEL_OK")
</pallas_src>

<mosaic_0001>
module attributes {stable_mosaic.version = 11 : i64} {
  func.func @_adapter_kernel(%arg0: i32, %arg1: memref<16x128xf32, #tpu.memory_space<vmem>>, %arg2: memref<128x128xf32, #tpu.memory_space<vmem>>, %arg3: memref<1x128xf32, #tpu.memory_space<vmem>>, %arg4: memref<128x128xf32, #tpu.memory_space<vmem>>, %arg5: memref<1x128xf32, #tpu.memory_space<vmem>>, %arg6: memref<16x128xf32, #tpu.memory_space<vmem>>) attributes {dimension_semantics = [#tpu.dimension_semantics<parallel>], iteration_bounds = array<i64: 2>, scalar_prefetch = 0 : i64, scratch_operands = 0 : i64, tpu.core_type = #tpu.core_type<tc>, window_params = [{transform_indices = @transform_0, window_bounds = array<i64: 16, 128>}, {pipeline_mode = #tpu.pipeline_mode<synchronous>, transform_indices = @transform_1, window_bounds = array<i64: 128, 128>}, {pipeline_mode = #tpu.pipeline_mode<synchronous>, transform_indices = @transform_2, window_bounds = array<i64: 1, 128>}, {pipeline_mode = #tpu.pipeline_mode<synchronous>, transform_indices = @transform_3, window_bounds = array<i64: 128, 128>}, {pipeline_mode = #tpu.pipeline_mode<synchronous>, transform_indices = @transform_4, window_bounds = array<i64: 1, 128>}, {transform_indices = @transform_5, window_bounds = array<i64: 16, 128>}]} {
    %c0 = arith.constant 0 : index
    %c0_0 = arith.constant 0 : index
    %0 = vector.load %arg1[%c0, %c0_0] : memref<16x128xf32, #tpu.memory_space<vmem>>, vector<16x128xf32>
    %c0_1 = arith.constant 0 : index
    %c0_2 = arith.constant 0 : index
    %1 = vector.load %arg2[%c0_1, %c0_2] : memref<128x128xf32, #tpu.memory_space<vmem>>, vector<128x128xf32>
    %cst = arith.constant dense<0.000000e+00> : vector<16x128xf32>
    %2 = tpu.matmul %0, %1, %cst {dimension_numbers = #tpu.dot_dimension_numbers<[1], [0], [0], [1], [0, 0, 1, 1], [], []>} : vector<16x128xf32>, vector<128x128xf32>, vector<16x128xf32> -> vector<16x128xf32>
    %c0_3 = arith.constant 0 : index
    %c0_4 = arith.constant 0 : index
    %3 = vector.load %arg3[%c0_3, %c0_4] : memref<1x128xf32, #tpu.memory_space<vmem>>, vector<1x128xf32>
    %4 = vector.broadcast %3 : vector<1x128xf32> to vector<16x128xf32>
    %5 = arith.addf %2, %4 : vector<16x128xf32>
    %cst_5 = arith.constant 5.000000e-01 : f32
    %6 = vector.broadcast %cst_5 : f32 to vector<16x128xf32>
    %7 = arith.mulf %6, %5 : vector<16x128xf32>
    %cst_6 = arith.constant 0.707106769 : f32
    %8 = vector.broadcast %cst_6 : f32 to vector<16x128xf32>
    %9 = arith.mulf %5, %8 : vector<16x128xf32>
    %10 = math.erf %9 : vector<16x128xf32>
    %cst_7 = arith.constant 1.000000e+00 : f32
    %11 = vector.broadcast %cst_7 : f32 to vector<16x128xf32>
    %12 = arith.addf %11, %10 : vector<16x128xf32>
    %13 = arith.mulf %7, %12 : vector<16x128xf32>
    %c0_8 = arith.constant 0 : index
    %c0_9 = arith.constant 0 : index
    %14 = vector.load %arg4[%c0_8, %c0_9] : memref<128x128xf32, #tpu.memory_space<vmem>>, vector<128x128xf32>
    %cst_10 = arith.constant dense<0.000000e+00> : vector<16x128xf32>
    %15 = tpu.matmul %13, %14, %cst_10 {dimension_numbers = #tpu.dot_dimension_numbers<[1], [0], [0], [1], [0, 0, 1, 1], [], []>} : vector<16x128xf32>, vector<128x128xf32>, vector<16x128xf32> -> vector<16x128xf32>
    %c0_11 = arith.constant 0 : index
    %c0_12 = arith.constant 0 : index
    %16 = vector.load %arg5[%c0_11, %c0_12] : memref<1x128xf32, #tpu.memory_space<vmem>>, vector<1x128xf32>
    %17 = vector.broadcast %16 : vector<1x128xf32> to vector<16x128xf32>
    %18 = arith.addf %15, %17 : vector<16x128xf32>
    %cst_13 = arith.constant 5.000000e-01 : f32
    %19 = vector.broadcast %cst_13 : f32 to vector<16x128xf32>
    %20 = arith.mulf %19, %0 : vector<16x128xf32>
    %21 = arith.addf %18, %20 : vector<16x128xf32>
    %c0_14 = arith.constant 0 : index
    %c0_15 = arith.constant 0 : index
    %22 = vector.load %arg6[%c0_14, %c0_15] : memref<16x128xf32, #tpu.memory_space<vmem>>, vector<16x128xf32>
    tpu.vector_store %arg6[%c0_14, %c0_15], %21 {strides = array<i32>} : memref<16x128xf32, #tpu.memory_space<vmem>>, vector<16x128xf32>,
    return
  }
  func.func @transform_0(%arg0: i32) -> (i32, i32) {
    %c0_i32 = arith.constant 0 : i32
    %c0_i32_0 = arith.constant 0 : i32
    return %arg0, %c0_i32 : i32, i32
  }
  func.func @transform_1(%arg0: i32) -> (i32, i32) {
    %c0_i32 = arith.constant 0 : i32
    %c0_i32_0 = arith.constant 0 : i32
    %c0_i32_1 = arith.constant 0 : i32
    return %c0_i32, %c0_i32_0 : i32, i32
  }
  func.func @transform_2(%arg0: i32) -> (i32, i32) {
    %c0_i32 = arith.constant 0 : i32
    %c0_i32_0 = arith.constant 0 : i32
    %c0_i32_1 = arith.constant 0 : i32
    return %c0_i32, %c0_i32_0 : i32, i32
  }
  func.func @transform_3(%arg0: i32) -> (i32, i32) {
    %c0_i32 = arith.constant 0 : i32
    %c0_i32_0 = arith.constant 0 : i32
    %c0_i32_1 = arith.constant 0 : i32
    return %c0_i32, %c0_i32_0 : i32, i32
  }
  func.func @transform_4(%arg0: i32) -> (i32, i32) {
    %c0_i32 = arith.constant 0 : i32
    %c0_i32_0 = arith.constant 0 : i32
    %c0_i32_1 = arith.constant 0 : i32
    return %c0_i32, %c0_i32_0 : i32, i32
  }
  func.func @transform_5(%arg0: i32) -> (i32, i32) {
    %c0_i32 = arith.constant 0 : i32
    %c0_i32_0 = arith.constant 0 : i32
    return %arg0, %c0_i32 : i32, i32
  }
}

module attributes {stable_mosaic.version = 11 : i64} {
  func.func @_adapter_kernel(%arg0: i32, %arg1: memref<16x128xf32, #tpu.memory_space<vmem>>, %arg2: memref<128x128xf32, #tpu.memory_space<vmem>>, %arg3: memref<1x128xf32, #tpu.memory_space<vmem>>, %arg4: memref<128x128xf32, #tpu.memory_space<vmem>>, %arg5: memref<1x128xf32, #tpu.memory_space<vmem>>, %arg6: memref<16x128xf32, #tpu.memory_space<vmem>>) attributes {dimension_semantics = [#tpu.dimension_semantics<parallel>], iteration_bounds = array<i64: 2>, scalar_prefetch = 0 : i64, scratch_operands = 0 : i64, tpu.core_type = #tpu.core_type<tc>, window_params = [{transform_indices = @transform_0, window_bounds = array<i64: 16, 128>}, {pipeline_mode = #tpu.pipeline_mode<synchronous>, transform_indices = @transform_1, window_bounds = array<i64: 128, 128>}, {pipeline_mode = #tpu.pipeline_mode<synchronous>, transform_indices = @transform_2, window_bounds = array<i64: 1, 128>}, {pipeline_mode = #tpu.pipeline_mode<synchronous>, transform_indices = @transform_3, window_bounds = array<i64: 128, 128>}, {pipeline_mode = #tpu.pipeline_mode<synchronous>, transform_indices = @transform_4, window_bounds = array<i64: 1, 128>}, {transform_indices = @transform_5, window_bounds = array<i64: 16, 128>}]} {
    %c0 = arith.constant 0 : index
    %c0_0 = arith.constant 0 : index
    %0 = vector.load %arg1[%c0, %c0_0] : memref<16x128xf32, #tpu.memory_space<vmem>>, vector<16x128xf32>
    %c0_1 = arith.constant 0 : index
    %c0_2 = arith.constant 0 : index
    %1 = vector.load %arg2[%c0_1, %c0_2] : memref<128x128xf32, #tpu.memory_space<vmem>>, vector<128x128xf32>
    %cst = arith.constant dense<0.000000e+00> : vector<16x128xf32>
    %2 = tpu.matmul %0, %1, %cst {dimension_numbers = #tpu.dot_dimension_numbers<[1], [0], [0], [1], [0, 0, 1, 1], [], []>} : vector<16x128xf32>, vector<128x128xf32>, vector<16x128xf32> -> vector<16x128xf32>
    %c0_3 = arith.constant 0 : index
    %c0_4 = arith.constant 0 : index
    %3 = vector.load %arg3[%c0_3, %c0_4] : memref<1x128xf32, #tpu.memory_space<vmem>>, vector<1x128xf32>
    %4 = vector.broadcast %3 : vector<1x128xf32> to vector<16x128xf32>
    %5 = arith.addf %2, %4 : vector<16x128xf32>
    %cst_5 = arith.constant 5.000000e-01 : f32
    %6 = vector.broadcast %cst_5 : f32 to vector<16x128xf32>
    %7 = arith.mulf %6, %5 : vector<16x128xf32>
    %cst_6 = arith.constant 0.707106769 : f32
    %8 = vector.broadcast %cst_6 : f32 to vector<16x128xf32>
    %9 = arith.mulf %5, %8 : vector<16x128xf32>
    %10 = math.erf %9 : vector<16x128xf32>
    %cst_7 = arith.constant 1.000000e+00 : f32
    %11 = vector.broadcast %cst_7 : f32 to vector<16x128xf32>
    %12 = arith.addf %11, %10 : vector<16x128xf32>
    %13 = arith.mulf %7, %12 : vector<16x128xf32>
    %c0_8 = arith.constant 0 : index
    %c0_9 = arith.constant 0 : index
    %14 = vector.load %arg4[%c0_8, %c0_9] : memref<128x128xf32, #tpu.memory_space<vmem>>, vector<128x128xf32>
    %cst_10 = arith.constant dense<0.000000e+00> : vector<16x128xf32>
    %15 = tpu.matmul %13, %14, %cst_10 {dimension_numbers = #tpu.dot_dimension_numbers<[1], [0], [0], [1], [0, 0, 1, 1], [], []>} : vector<16x128xf32>, vector<128x128xf32>, vector<16x128xf32> -> vector<16x128xf32>
    %c0_11 = arith.constant 0 : index
    %c0_12 = arith.constant 0 : index
    %16 = vector.load %arg5[%c0_11, %c0_12] : memref<1x128xf32, #tpu.memory_space<vmem>>, vector<1x128xf32>
    %17 = vector.broadcast %16 : vector<1x128xf32> to vector<16x128xf32>
    %18 = arith.addf %15, %17 : vector<16x128xf32>
    %cst_13 = arith.constant 5.000000e-01 : f32
    %19 = vector.broadcast %cst_13 : f32 to vector<16x128xf32>
    %20 = arith.mulf %19, %0 : vector<16x128xf32>
    %21 = arith.addf %18, %20 : vector<16x128xf32>
    %c0_14 = arith.constant 0 : index
    %c0_15 = arith.constant 0 : index
    %22 = vector.load %arg6[%c0_14, %c0_15] : memref<16x128xf32, #tpu.memory_space<vmem>>, vector<16x128xf32>
    tpu.vector_store %arg6[%c0_14, %c0_15], %21 {strides = array<i32>} : memref<16x128xf32, #tpu.memory_space<vmem>>, vector<16x128xf32>,
    return
  }
  func.func @transform_0(%arg0: i32) -> (i32, i32) {
    %c0_i32 = arith.constant 0 : i32
    %c0_i32_0 = arith.constant 0 : i32
    return %arg0, %c0_i32 : i32, i32
  }
  func.func @transform_1(%arg0: i32) -> (i32, i32) {
    %c0_i32 = arith.constant 0 : i32
    %c0_i32_0 = arith.constant 0 : i32
    %c0_i32_1 = arith.constant 0 : i32
    return %c0_i32, %c0_i32_0 : i32, i32
  }
  func.func @transform_2(%arg0: i32) -> (i32, i32) {
    %c0_i32 = arith.constant 0 : i32
    %c0_i32_0 = arith.constant 0 : i32
    %c0_i32_1 = arith.constant 0 : i32
    return %c0_i32, %c0_i32_0 : i32, i32
  }
  func.func @transform_3(%arg0: i32) -> (i32, i32) {
    %c0_i32 = arith.constant 0 : i32
    %c0_i32_0 = arith.constant 0 : i32
    %c0_i32_1 = arith.constant 0 : i32
    return %c0_i32, %c0_i32_0 : i32, i32
  }
  func.func @transform_4(%arg0: i32) -> (i32, i32) {
    %c0_i32 = arith.constant 0 : i32
    %c0_i32_0 = arith.constant 0 : i32
    %c0_i32_1 = arith.constant 0 : i32
    return %c0_i32, %c0_i32_0 : i32, i32
  }
  func.func @transform_5(%arg0: i32) -> (i32, i32) {
    %c0_i32 = arith.constant 0 : i32
    %c0_i32_0 = arith.constant 0 : i32
    return %arg0, %c0_i32 : i32, i32
  }
}

</mosaic_0001>

<bundles_post_ra>
// kernel: tpu_custom_call.1
= control target key start
LH: loop header
LB: loop body
LE: loop exit
PB: predicated region body
PF: predicated region fallthrough
CT: control target
= control target key end

     0   :  { %10 = vsyncpa [#allocation3], 0  ;;  %s1318_s0 = inlined_call_operand.hbm [shape: f32[32,128], index: 0, kind: input, shape index: {}]   ;;  %s1319_s1 = inlined_call_operand.hbm [shape: f32[128,128], index: 1, kind: input, shape index: {}]   ;;  %s1320_s2 = inlined_call_operand.vmem [shape: f32[1,128], index: 2, kind: input, shape index: {}]   ;;  %s1321_s3 = inlined_call_operand.hbm [shape: f32[128,128], index: 3, kind: input, shape index: {}]   ;;  %s1322_s4 = inlined_call_operand.vmem [shape: f32[1,128], index: 4, kind: input, shape index: {}]   ;;  %s1323_s5 = inlined_call_operand.hbm [shape: f32[32,128], index: 5, kind: output, shape index: {}]  }
   0x1   :  { %12 = vsyncpa [#allocation3 + $0x1], 0 }
   0x2   :  { %13 = vsyncpa [#allocation6], 0 }
   0x3   :  { %14 = vsyncpa [#allocation4], 0 }
   0x4   :  { %16 = vsyncpa [#allocation4 + $0x1], 0  ;;  %s1057_s18 = smov 0   ;;  %s1059_s19 = smov 0  }
   0x5   :  { %s1061_s20 = smov 0   ;;  %s1063_s21 = smov 0  }
   0x6 LB: > { %s1078_s22 = sadd.s32 4294967295, %s1017_s21   ;;  %s594_s23 = sadd.s32 4294967294, %s1017_s21   ;;  %s1017_s21 = sphi %s1063_s21, %s1343_s21   ;;  %s1013_s20 = sphi %s1061_s20, %s1342_s20   ;;  %s1009_s19 = sphi %s1059_s19, %s1341_s19   ;;  %s1005_s18 = sphi %s1057_s18, %s1340_s18  }
   0x7   : > { %p42_p0 = scmp.ne.s32.totalorder %s1009_s19, %s1005_s18  ;;  %p1324_p1 = scmp.eq.s32.totalorder %s1078_s22, 0 }
   0x8   : > { %p156_p3 = scmp.eq.s32.totalorder %s594_s23, 1  ;;  %p595_p5 = scmp.ge.s32.totalorder %s1017_s21, 1 }
   0x9   : > { %p1087_p4 = por %p1324_p1, %p42_p0  ;;  %p163_p7 = scmp.lt.s32.totalorder %s1017_s21, 3 }
   0xa   : > { %p1092_p6 = por %p156_p3, %p42_p0  ;;  %s1019_s27 = smov [#allocation5]  }
   0xb   : > { %s1327_s24 = scalar_select %p1087_p4, 1, 0 }
   0xc   : > { %s1328_s25 = scalar_select %p1092_p6, 1, 0 }
   0xd   : > { %p1097_p8 = pnand %p595_p5, %p163_p7  ;;  %s175_s28 = sshll.u32 %s1019_s27, 4  ;;  %s1101_s28 = int_to_ptr.vmem [resolvable:$true] %s175_s28 }
   0xe   : > { %s1020_s30 = smov [#allocation7]   ;;  %s861_s9 = scalar_lea.hbm %s1319_s1, 2048 }
   0xf   : > { %p798_p9 = pneg %p1097_p8  ;;  %s191_s6 = sshll.u32 %s1020_s30, 4  ;;  %s1112_s6 = int_to_ptr.vmem [resolvable:$true] %s191_s6 }
  0x10   : > { %p862_p12 = scmp.ne.s32.totalorder %s1319_s1, %s861_s9  ;;  %p868_p5 = scmp.lt.u32.totalorder %s861_s9, %s1319_s1 }
  0x11   : > { %p1108_p11 = pnand %p798_p9, %p1324_p1 }
  0x13   : > { %p863_p13 = pneg %p1108_p11 }
  0x15   : > { %p864_p0 = pnand %p863_p13, %p862_p12 }
  0x17   : > { %p865_p3 = pneg %p864_p0 }
  0x19   : > { %p870_p7 = pnand %p868_p5, %p865_p3 }
  0x1b   : > { %873 = shalt.err (!%p870_p7)
}
  0x1c   : > { %s874_s14 = scalar_lea.vmem %s1101_s28, 2048  ;;  %p882_p2 = scmp.lt.s32.totalorder %s1101_s28, %s1101_s28 }
  0x1d   : > { %p875_p9 = scmp.ne.s32.totalorder %s1101_s28, %s874_s14  ;;  %p883_p12 = scmp.lt.s32.totalorder %s874_s14, %s874_s14 }
  0x1f   : > { %p877_p10 = pnand %p875_p9, %p863_p13  ;;  %p884_p0 = por %p883_p12, %p882_p2 }
  0x21   : > { %p878_p1 = pneg %p877_p10 }
  0x23   : > { %p885_p6 = pnand %p884_p0, %p878_p1 }
  0x25   : > { %888 = shalt.err (!%p885_p6)
}
  0x26   : > { %s1021_s15 = smov 128   ;;  %s1022_s16 = smov 8  }
  0x27   : > { %801 = dma.hbm_to_vmem [thread:$0]  (!%p1108_p11), %s1319_s1, 2048, %s1101_s28, [#allocation6], %s1021_s15, %s1021_s15, %s1022_s16  }
  0x28   : > { %s889_s7 = scalar_lea.hbm %s1321_s3, 2048 }
  0x29   : > { %p890_p1 = scmp.ne.s32.totalorder %s1321_s3, %s889_s7  ;;  %p896_p10 = scmp.lt.u32.totalorder %s889_s7, %s1321_s3 }
  0x2b   : > { %p892_p2 = pnand %p890_p1, %p863_p13 }
  0x2d   : > { %p893_p6 = pneg %p892_p2 }
  0x2f   : > { %p898_p3 = pnand %p896_p10, %p893_p6 }
  0x31   : > { %901 = shalt.err (!%p898_p3)
}
  0x32   : > { %s902_s28 = scalar_lea.vmem %s1112_s6, 2048  ;;  %p910_p12 = scmp.lt.s32.totalorder %s1112_s6, %s1112_s6 }
  0x33   : > { %p903_p5 = scmp.ne.s32.totalorder %s1112_s6, %s902_s28  ;;  %p911_p0 = scmp.lt.s32.totalorder %s902_s28, %s902_s28 }
  0x35   : > { %p905_p7 = pnand %p903_p5, %p863_p13  ;;  %p912_p1 = por %p911_p0, %p910_p12 }
  0x37   : > { %p906_p9 = pneg %p905_p7 }
  0x39   : > { %p913_p2 = pnand %p912_p1, %p906_p9 }
  0x3b   : > { %916 = shalt.err (!%p913_p2)
}
  0x3c   : > { %804 = dma.hbm_to_vmem [thread:$0]  (!%p1108_p11), %s1321_s3, 2048, %s1112_s6, [#allocation6], %s1021_s15, %s1021_s15, %s1022_s16  }
  0x3d   : > { %s1173_s29 = sadd.s32 1, %s1017_s21   ;;  %s29_s14 = sadd.s32 1, %s1013_s20 }
  0x3e   : > { %s26_s17 = ssub.s32 %s1017_s21, %s1173_s29  ;;  %p36_p13 = scmp.ne.s32.totalorder %s1013_s20, %s1009_s19 }
  0x3f   : > { %p27_p6 = scmp.eq.s32.totalorder %s26_s17, 0  ;;  %p37_p10 = scmp.eq.s32.totalorder %s1017_s21, 0 }
  0x40   : > { %p1331_p3 = scmp.eq.s32.totalorder %s1078_s22, 1  ;;  %p815_p7 = scmp.lt.s32.totalorder %s1017_s21, 2 }
  0x41   : > { %s1189_s27 = scalar_select %p27_p6, %s1013_s20, %s29_s14  }
  0x42   : > { %p1183_p5 = por %p1331_p3, %p36_p13  ;;  %p38_p9 = por %p37_p10, %p36_p13 }
  0x43   : > { %s208_s30 = sand.u32 1, %s1013_s20   ;;  %s614_s6 = sshll.u32 %s1017_s21, 8 }
  0x44   : > { %s1332_s23 = scalar_select %p1183_p5, 1, 0 }
  0x45   : > { %s599_s7 = sshll.u32 %s208_s30, 4  ;;  %s1196_s10 = scalar_lea.hbm %s1318_s0, %s614_s6 }
  0x46   : > { %s212_s11 = scalar_lea.vmem [#allocation2], %s599_s7  ;;  %p1200_p11 = pnand %p815_p7, %p38_p9 }
  0x47   : > { %s219_s28 = sshll.u32 %s212_s11, 4  ;;  %s1204_s13 = scalar_lea.sflag [#allocation3], %s208_s30  ;;  %s1198_s28 = int_to_ptr.vmem [resolvable:$true] %s219_s28 }
  0x48   : > { %s917_s14 = scalar_lea.hbm %s1196_s10, 256  ;;  %p919_p0 = pneg %p1200_p11 }
  0x49   : > { %p918_p12 = scmp.ne.s32.totalorder %s1196_s10, %s917_s14  ;;  %s922_s6 = scalar_lea.hbm %s1318_s0, 512 }
  0x4a   : > { %p923_p13 = scmp.lt.u32.totalorder %s1196_s10, %s1318_s0  ;;  %p924_p6 = scmp.lt.u32.totalorder %s922_s6, %s917_s14 }
  0x4b   : > { %p920_p1 = pnand %p919_p0, %p918_p12  ;;  %p926_p3 = scmp.lt.u32.totalorder %s917_s14, %s1196_s10 }
  0x4c   : > { %p925_p10 = por %p924_p6, %p923_p13 }
  0x4d   : > { %p921_p2 = pneg %p920_p1 }
  0x4e   : > { %p927_p7 = por %p926_p3, %p925_p10 }
  0x50   : > { %p928_p9 = pnand %p927_p7, %p921_p2 }
  0x52   : > { %931 = shalt.err (!%p928_p9)
}
  0x53   : > { %s932_s30 = scalar_lea.vmem %s1198_s28, 256  ;;  %s1023_s11 = smov [#allocation2]  }
  0x54   : > { %p933_p12 = scmp.ne.s32.totalorder %s1198_s28, %s932_s30  ;;  %s937_s17 = sshll.u32 %s1023_s11, 4  ;;  %s938_s17 = int_to_ptr.vmem [resolvable:$false] %s937_s17 }
  0x55   : > { %s939_s7 = scalar_lea.vmem %s938_s17, 512  ;;  %p940_p4 = scmp.lt.s32.totalorder %s1198_s28, %s938_s17 }
  0x56   : > { %p935_p1 = pnand %p933_p12, %p919_p0  ;;  %p941_p13 = scmp.lt.s32.totalorder %s939_s7, %s932_s30 }
  0x58   : > { %p936_p5 = pneg %p935_p1  ;;  %p942_p6 = por %p941_p13, %p940_p4 }
  0x5a   : > { %p943_p10 = pnand %p942_p6, %p936_p5 }
  0x5c   : > { %946 = shalt.err (!%p943_p10)
}
  0x5d   : > { %808 = dma.hbm_to_vmem [thread:$0]  (!%p1200_p11), %s1196_s10, 256, %s1198_s28, %s1204_s13, %s1021_s15, %s1021_s15, %s1022_s16  }
  0x5e   : > { %231 = sbr.rel (%p1097_p8) target bundleno = 605 (0x25d), region = 40  ;;  %s1238_s14 = sand.u32 (!%p1097_p8), 1, %s1009_s19  }
  0x5f   : > { %s603_s6 = sshll.u32 (!%p1097_p8), %s1238_s14, 4  ;;  %s234_s8 = scalar_lea.sflag (!%p1097_p8), [#allocation3], %s1238_s14 }
  0x60   : > { %s1244_s12 = scalar_lea.vmem (!%p1097_p8), [#allocation2], %s603_s6  ;;  %p1334_p4 = scmp.ne.s32.totalorder (!%p1097_p8), %s1327_s24, 0 }
  0x65   : > { %992 = dma.done.wait (%p1334_p4), %s234_s8, 256  }
  0x66   : > { %994 = vsyncadd (%p1334_p4), %s234_s8, 4294967040  ;;  %p1335_p5 = scmp.eq.s32.totalorder %s1078_s22, 0 }
  0x68   : > { %996 = dma.done.wait (%p1335_p5), [#allocation6], 4096   ;;  %p1336_p8 = pmov %p1335_p5 }
  0x69   : > { %v276_v0 = vld [vmem:[#allocation5] sm:$0xff]  ;;  %v277_v1 = vld [vmem:[#allocation5 + $0x8] sm:$0xff]  ;;  %v278_v2 = vld [vmem:[#allocation5 + $0x10] sm:$0xff]  ;;  %s271_s10 = scalar_lea.vmem [#allocation8], %s603_s6  ;;  %s615_s13 = sshll.u32 %s1078_s22, 8 }
  0x6a   : > { %998 = vsyncadd (%p1336_p8), [#allocation6], 4294963200  ;;  %v722_v3 = vpack.c.bf16 %v277_v1, %v276_v0  ;;  %v279_v4 = vld [vmem:[#allocation5 + $0x18] sm:$0xff]  ;;  %v280_v6 = vld [vmem:[#allocation5 + $0x20] sm:$0xff]  ;;  %s502_s28 = sshll.u32 %s271_s10, 4  ;;  %s1274_s11 = scalar_lea.hbm %s1323_s5, %s615_s13  ;;  %s1269_s28 = int_to_ptr.vmem [resolvable:$true] %s502_s28 }
  0x6b   : > { %v726_v5 = vpack.c.bf16 %v279_v4, %v278_v2  ;;  %v281_v7 = vld [vmem:[#allocation5 + $0x28] sm:$0xff]  ;;  %v282_v9 = vld [vmem:[#allocation5 + $0x30] sm:$0xff]  ;;  %v283_v10 = vld [vmem:[#allocation5 + $0x38] sm:$0xff]  ;;  %s489_s17 = scalar_lea.sflag [#allocation4], %s1238_s14  ;;  %s947_s7 = scalar_lea.vmem %s1269_s28, 256 }
  0x6c   : > { %723 = vmatprep.subr.bf16.mxu0 %v722_v3  ;;  %v730_v8 = vpack.c.bf16 %v281_v7, %v280_v6  ;;  %v1255_v11 = vld [vmem:[%s1244_s12] sm:$0xff]  ;;  %v385_v13 = vld [vmem:[#allocation7 + $0x8] sm:$0xff]  ;;  %v387_v16 = vld [vmem:[#allocation7 + $0x18] sm:$0xff]  ;;  %v734_v20 = vpack.c.bf16 %v283_v10, %v282_v9  ;;  %p948_p11 = scmp.ne.s32.totalorder %s1269_s28, %s947_s7  ;;  %p1337_p0 = scmp.ne.s32.totalorder %s1332_s23, 0 }
  0x6d   : > { %725 = vmatpush3.bf16.msra.mxu0 %v722_v3  ;;  %684 = vmatprep.mubr.f32.mxu0 %v1255_v11  ;;  %v384_v12 = vld [vmem:[#allocation7] sm:$0xff]  ;;  %v386_v14 = vld [vmem:[#allocation7 + $0x10] sm:$0xff]  ;;  %v389_v19 = vld [vmem:[#allocation7 + $0x28] sm:$0xff]  ;;  %v482_v3 = vmul.f32 0.5, %v1255_v11  ;;  %s1024_s22 = smov [#allocation8]  }
  0x6e   : > { %727 = vmatprep.subr.bf16.mxu0 %v726_v5  ;;  %v754_v15 = vpack.c.bf16 %v385_v13, %v384_v12  ;;  %v758_v17 = vpack.c.bf16 %v387_v16, %v386_v14  ;;  %v388_v18 = vld [vmem:[#allocation7 + $0x20] sm:$0xff]  ;;  %v285_v22 = vld [vmem:[#allocation5 + $0x48] sm:$0xff]  ;;  %v286_v25 = vld [vmem:[#allocation5 + $0x50] sm:$0xff]  ;;  %p949_p2 = pnand %p948_p11, %p1337_p0  ;;  %s951_s6 = sshll.u32 %s1024_s22, 4  ;;  %s952_s6 = int_to_ptr.vmem [resolvable:$false] %s951_s6 }
  0x6f   : > { %v284_v21 = vld [vmem:[#allocation5 + $0x40] sm:$0xff]  ;;  %v762_v23 = vpack.c.bf16 %v389_v19, %v388_v18  ;;  %v287_v26 = vld [vmem:[#allocation5 + $0x58] sm:$0xff]  ;;  %v289_v29 = vld [vmem:[#allocation5 + $0x68] sm:$0xff]  ;;  %s953_s8 = scalar_lea.vmem %s952_s6, 512  ;;  %p954_p7 = scmp.lt.s32.totalorder %s1269_s28, %s952_s6 }
  0x70   : > { %755 = vmatprep.subr.bf16.mxu1 %v754_v15  ;;  %v738_v24 = vpack.c.bf16 %v285_v22, %v284_v21  ;;  %v742_v27 = vpack.c.bf16 %v287_v26, %v286_v25  ;;  %v288_v28 = vld [vmem:[#allocation5 + $0x60] sm:$0xff]  ;;  %v290_v31 = vld [vmem:[#allocation5 + $0x70] sm:$0xff]  ;;  %v291_v32 = vld [vmem:[#allocation5 + $0x78] sm:$0xff]  ;;  %p950_p3 = pneg %p949_p2  ;;  %p955_p9 = scmp.lt.s32.totalorder %s953_s8, %s947_s7 }
  0x71   : > { %729 = vmatpush3.bf16.msra.mxu0 %v726_v5  ;;  %757 = vmatpush3.bf16.msra.mxu1 %v754_v15  ;;  %v746_v30 = vpack.c.bf16 %v289_v29, %v288_v28  ;;  %v750_v33 = vpack.c.bf16 %v291_v32, %v290_v31  ;;  %v275_v34 = vld [vmem:[%s1244_s12 + $0x8] sm:$0xff]  ;;  %v390_v35 = vld [vmem:[#allocation7 + $0x30] sm:$0xff]  ;;  %v392_v38 = vld [vmem:[#allocation7 + $0x40] sm:$0xff] }
  0x72   : > { %731 = vmatprep.subr.bf16.mxu0 %v730_v8  ;;  %759 = vmatprep.subr.bf16.mxu1 %v758_v17  ;;  %v391_v36 = vld [vmem:[#allocation7 + $0x38] sm:$0xff]  ;;  %v393_v39 = vld [vmem:[#allocation7 + $0x48] sm:$0xff]  ;;  %v394_v41 = vld [vmem:[#allocation7 + $0x50] sm:$0xff]  ;;  %v483_v2 = vmul.f32 0.5, %v275_v34  ;;  %p956_p12 = por %p955_p9, %p954_p7 }
  0x73   : > { %v766_v37 = vpack.c.bf16 %v391_v36, %v390_v35  ;;  %v770_v40 = vpack.c.bf16 %v393_v39, %v392_v38  ;;  %v395_v42 = vld [vmem:[#allocation7 + $0x58] sm:$0xff]  ;;  %v396_v44 = vld [vmem:[#allocation7 + $0x60] sm:$0xff]  ;;  %v397_v45 = vld [vmem:[#allocation7 + $0x68] sm:$0xff] }
  0x74   : > { %v774_v43 = vpack.c.bf16 %v395_v42, %v394_v41  ;;  %v778_v46 = vpack.c.bf16 %v397_v45, %v396_v44  ;;  %v398_v47 = vld [vmem:[#allocation7 + $0x70] sm:$0xff]  ;;  %v399_v48 = vld [vmem:[#allocation7 + $0x78] sm:$0xff]  ;;  %v607_v50 = vld [vmem:[%s1320_s2] ss:$0 sm:$0xff]  ;;  %p957_p1 = pnand %p956_p12, %p950_p3 }
  0x75   : > { %733 = vmatpush3.bf16.msra.mxu0 %v730_v8  ;;  %761 = vmatpush3.bf16.msra.mxu1 %v758_v17  ;;  %v782_v49 = vpack.c.bf16 %v399_v48, %v398_v47  ;;  %v608_v1 = vld [vmem:[%s1322_s4] ss:$0 sm:$0xff] }
  0x76   : > { %735 = vmatprep.subr.bf16.mxu0 %v734_v20  ;;  %763 = vmatprep.subr.bf16.mxu1 %v762_v23 }
  0x79   : > { %737 = vmatpush3.bf16.msra.mxu0 %v734_v20  ;;  %765 = vmatpush3.bf16.msra.mxu1 %v762_v23 }
  0x7a   : > { %739 = vmatprep.subr.bf16.mxu0 %v738_v24  ;;  %767 = vmatprep.subr.bf16.mxu1 %v766_v37 }
  0x7d   : > { %741 = vmatpush3.bf16.msra.mxu0 %v738_v24  ;;  %769 = vmatpush3.bf16.msra.mxu1 %v766_v37 }
  0x7e   : > { %743 = vmatprep.subr.bf16.mxu0 %v742_v27  ;;  %771 = vmatprep.subr.bf16.mxu1 %v770_v40 }
  0x81   : > { %745 = vmatpush3.bf16.msra.mxu0 %v742_v27  ;;  %773 = vmatpush3.bf16.msra.mxu1 %v770_v40 }
  0x82   : > { %747 = vmatprep.subr.bf16.mxu0 %v746_v30  ;;  %775 = vmatprep.subr.bf16.mxu1 %v774_v43 }
  0x85   : > { %749 = vmatpush3.bf16.msra.mxu0 %v746_v30  ;;  %777 = vmatpush3.bf16.msra.mxu1 %v774_v43 }
  0x86   : > { %751 = vmatprep.subr.bf16.mxu0 %v750_v33  ;;  %779 = vmatprep.subr.bf16.mxu1 %v778_v46 }
  0x89   : > { %753 = vmatpush3.bf16.msra.mxu0 %v750_v33  ;;  %781 = vmatpush3.bf16.msra.mxu1 %v778_v46 }
  0x8a   : > { %783 = vmatprep.subr.bf16.mxu1 %v782_v49 }
  0x8c   : > { %685 = vmatmul.mubr.f32.vlgmr.msra.gmra.mrb[0].mxu0 %v275_v34 }
  0x8d   : > { %785 = vmatpush3.bf16.msra.mxu1 %v782_v49 }
 0x15f   : > { %v686_v51 = vpop.f32.mrb[0].mxu0 }
 0x160   : > { %v371_v52 = vadd.f32 %v686_v51, %v607_v50  ;;  %v365_v53 = vpop.f32.mrb[1].mxu0 }
 0x161   : > { %v366_v54 = vadd.f32 %v607_v50, %v365_v53 }
 0x162   : > { %v377_v55 = vmul.f32 0.70710677, %v371_v52  ;;  %v375_v62 = vmul.f32 0.5, %v371_v52 }
 0x163   : > { %v376_v56 = vmul.f32 0.70710677, %v366_v54  ;;  %v374_v60 = vmul.f32 0.5, %v366_v54 }
 0x164   : > { %857 = verf.f32 %v377_v55 }
 0x165   : > { %859 = verf.f32 %v376_v56 }
 0x16e   : > { %v858_v57 = vpop.eup %857 }
 0x16f   : > { %v860_v58 = vpop.eup %859  ;;  %v381_v59 = vadd.f32 1.0, %v858_v57 }
 0x170   : > { %v380_v61 = vadd.f32 1.0, %v860_v58 }
 0x171   : > { %v383_v0 = vmul.f32 %v381_v59, %v375_v62 }
 0x172   : > { %v382_v63 = vmul.f32 %v380_v61, %v374_v60 }
 0x174   : > { %719 = vmatprep.mubr.f32.mxu1 %v382_v63 }
 0x175   : > { %720 = vmatmul.mubr.f32.vlgmr.msra.gmra.mrb[0].mxu1 %v383_v0 }
 0x248   : > { %v721_v4 = vpop.f32.mrb[0].mxu1 }
 0x249   : > { %v479_v5 = vadd.f32 %v721_v4, %v608_v1  ;;  %v473_v6 = vpop.f32.mrb[1].mxu1 }
 0x24a   : > { %v474_v7 = vadd.f32 %v608_v1, %v473_v6 }
 0x24b   : > { %v485_v8 = vadd.f32 %v483_v2, %v479_v5 }
 0x24c   : > { %v484_v9 = vadd.f32 %v482_v3, %v474_v7 }
 0x24d   : > { %487 = vst [vmem:[%s271_s10 + $0x8] sm:$0xff] %v485_v8 }
 0x24e   : > { %486 = vst [vmem:[%s271_s10] sm:$0xff] %v484_v9 }
 0x24f   : > { %960 = shalt.err (!%p957_p1)
}
 0x250   : > { %s961_s12 = scalar_lea.hbm %s1274_s11, 256  ;;  %s965_s15 = scalar_lea.hbm %s1323_s5, 512 }
 0x251   : > { %p962_p13 = scmp.ne.s32.totalorder %s1274_s11, %s961_s12  ;;  %p966_p4 = scmp.lt.u32.totalorder %s1274_s11, %s1323_s5 }
 0x252   : > { %p967_p5 = scmp.lt.u32.totalorder %s965_s15, %s961_s12  ;;  %p969_p11 = scmp.lt.u32.totalorder %s961_s12, %s1274_s11 }
 0x253   : > { %p963_p6 = pnand %p962_p13, %p1337_p0 }
 0x254   : > { %p968_p8 = por %p967_p5, %p966_p4 }
 0x255   : > { %p964_p10 = pneg %p963_p6 }
 0x256   : > { %p970_p2 = por %p969_p11, %p968_p8 }
 0x258   : > { %p971_p3 = pnand %p970_p2, %p964_p10 }
 0x25a   : > { %974 = shalt.err (!%p971_p3)
}
 0x25b   : > { %s1025_s13 = smov 128   ;;  %s1026_s9 = smov 8  }
 0x25c   : > { %796 = dma.vmem_to_hbm [thread:$0]  (%p1337_p0), %s1269_s28, 256, %s1274_s11, %s489_s17, %s1025_s13, %s1025_s13, %s1026_s9  }
 0x25d PF: > { %s517_s30 = sand.u32 1, %s1005_s18   ;;  %p1338_p7 = scmp.ne.s32.totalorder %s1328_s25, 0 }
 0x25e   : > { %p1339_p9 = scmp.ge.s32.totalorder %s1017_s21, 2  ;;  %s518_s7 = scalar_lea.sflag [#allocation4], %s517_s30 }
 0x260   : > { %p810_p12 = pnand %p1339_p9, %p1338_p7 }
 0x262   : > { %1000 = dma.done.wait (!%p810_p12), %s518_s7, 256  }
 0x263   : > { %1002 = vsyncadd (!%p810_p12), %s518_s7, 4294967040  ;;  %p19_p1 = scmp.ge.s32.totalorder %s1173_s29, 4   ;;  %s1340_s18 = smov %s1009_s19 }
 0x264   : > { %s1341_s19 = smov %s1013_s20  ;;  %s1342_s20 = smov %s1189_s27 }
 0x265   : > { %s1343_s21 = smov %s1173_s29  ;;  %21 = sbr.rel (!%p19_p1) target bundleno = 6 (0x6), region = 93 }
 0x26c   :  { %523 = vsyncpa [#allocation3], 1 }
 0x26d   :  { %525 = vsyncpa [#allocation3 + $0x1], 1 }
 0x26e   :  { %526 = vsyncpa [#allocation6], 1 }
 0x26f   :  { %527 = vsyncpa [#allocation4], 1 }
 0x270   :  { %529 = vsyncpa [#allocation4 + $0x1], 1 }

// kernel: tpu_custom_call.1
= control target key start
LH: loop header
LB: loop body
LE: loop exit
PB: predicated region body
PF: predicated region fallthrough
CT: control target
= control target key end

     0   :  { %10 = vsyncpa [#allocation3], 0  ;;  %s1318_s0 = inlined_call_operand.hbm [shape: f32[32,128], index: 0, kind: input, shape index: {}]   ;;  %s1319_s1 = inlined_call_operand.hbm [shape: f32[128,128], index: 1, kind: input, shape index: {}]   ;;  %s1320_s2 = inlined_call_operand.vmem [shape: f32[1,128], index: 2, kind: input, shape index: {}]   ;;  %s1321_s3 = inlined_call_operand.hbm [shape: f32[128,128], index: 3, kind: input, shape index: {}]   ;;  %s1322_s4 = inlined_call_operand.vmem [shape: f32[1,128], index: 4, kind: input, shape index: {}]   ;;  %s1323_s5 = inlined_call_operand.hbm [shape: f32[32,128], index: 5, kind: output, shape index: {}]  }
   0x1   :  { %12 = vsyncpa [#allocation3 + $0x1], 0 }
   0x2   :  { %13 = vsyncpa [#allocation6], 0 }
   0x3   :  { %14 = vsyncpa [#allocation4], 0 }
   0x4   :  { %16 = vsyncpa [#allocation4 + $0x1], 0  ;;  %s1057_s18 = smov 0   ;;  %s1059_s19 = smov 0  }
   0x5   :  { %s1061_s20 = smov 0   ;;  %s1063_s21 = smov 0  }
   0x6 LB: > { %s1078_s22 = sadd.s32 4294967295, %s1017_s21   ;;  %s594_s23 = sadd.s32 4294967294, %s1017_s21   ;;  %s1017_s21 = sphi %s1063_s21, %s1343_s21   ;;  %s1013_s20 = sphi %s1061_s20, %s1342_s20   ;;  %s1009_s19 = sphi %s1059_s19, %s1341_s19   ;;  %s1005_s18 = sphi %s1057_s18, %s1340_s18  }
   0x7   : > { %p42_p0 = scmp.ne.s32.totalorder %s1009_s19, %s1005_s18  ;;  %p1324_p1 = scmp.eq.s32.totalorder %s1078_s22, 0 }
   0x8   : > { %p156_p3 = scmp.eq.s32.totalorder %s594_s23, 1  ;;  %p595_p5 = scmp.ge.s32.totalorder %s1017_s21, 1 }
   0x9   : > { %p1087_p4 = por %p1324_p1, %p42_p0  ;;  %p163_p7 = scmp.lt.s32.totalorder %s1017_s21, 3 }
   0xa   : > { %p1092_p6 = por %p156_p3, %p42_p0  ;;  %s1019_s27 = smov [#allocation5]  }
   0xb   : > { %s1327_s24 = scalar_select %p1087_p4, 1, 0 }
   0xc   : > { %s1328_s25 = scalar_select %p1092_p6, 1, 0 }
   0xd   : > { %p1097_p8 = pnand %p595_p5, %p163_p7  ;;  %s175_s28 = sshll.u32 %s1019_s27, 4  ;;  %s1101_s28 = int_to_ptr.vmem [resolvable:$true] %s175_s28 }
   0xe   : > { %s1020_s30 = smov [#allocation7]   ;;  %s861_s9 = scalar_lea.hbm %s1319_s1, 2048 }
   0xf   : > { %p798_p9 = pneg %p1097_p8  ;;  %s191_s6 = sshll.u32 %s1020_s30, 4  ;;  %s1112_s6 = int_to_ptr.vmem [resolvable:$true] %s191_s6 }
  0x10   : > { %p862_p12 = scmp.ne.s32.totalorder %s1319_s1, %s861_s9  ;;  %p868_p5 = scmp.lt.u32.totalorder %s861_s9, %s1319_s1 }
  0x11   : > { %p1108_p11 = pnand %p798_p9, %p1324_p1 }
  0x13   : > { %p863_p13 = pneg %p1108_p11 }
  0x15   : > { %p864_p0 = pnand %p863_p13, %p862_p12 }
  0x17   : > { %p865_p3 = pneg %p864_p0 }
  0x19   : > { %p870_p7 = pnand %p868_p5, %p865_p3 }
  0x1b   : > { %873 = shalt.err (!%p870_p7)
}
  0x1c   : > { %s874_s14 = scalar_lea.vmem %s1101_s28, 2048  ;;  %p882_p2 = scmp.lt.s32.totalorder %s1101_s28, %s1101_s28 }
  0x1d   : > { %p875_p9 = scmp.ne.s32.totalorder %s1101_s28, %s874_s14  ;;  %p883_p12 = scmp.lt.s32.totalorder %s874_s14, %s874_s14 }
  0x1f   : > { %p877_p10 = pnand %p875_p9, %p863_p13  ;;  %p884_p0 = por %p883_p12, %p882_p2 }
  0x21   : > { %p878_p1 = pneg %p877_p10 }
  0x23   : > { %p885_p6 = pnand %p884_p0, %p878_p1 }
  0x25   : > { %888 = shalt.err (!%p885_p6)
}
  0x26   : > { %s1021_s15 = smov 128   ;;  %s1022_s16 = smov 8  }
  0x27   : > { %801 = dma.hbm_to_vmem [thread:$0]  (!%p1108_p11), %s1319_s1, 2048, %s1101_s28, [#allocation6], %s1021_s15, %s1021_s15, %s1022_s16  }
  0x28   : > { %s889_s7 = scalar_lea.hbm %s1321_s3, 2048 }
  0x29   : > { %p890_p1 = scmp.ne.s32.totalorder %s1321_s3, %s889_s7  ;;  %p896_p10 = scmp.lt.u32.totalorder %s889_s7, %s1321_s3 }
  0x2b   : > { %p892_p2 = pnand %p890_p1, %p863_p13 }
  0x2d   : > { %p893_p6 = pneg %p892_p2 }
  0x2f   : > { %p898_p3 = pnand %p896_p10, %p893_p6 }
  0x31   : > { %901 = shalt.err (!%p898_p3)
}
  0x32   : > { %s902_s28 = scalar_lea.vmem %s1112_s6, 2048  ;;  %p910_p12 = scmp.lt.s32.totalorder %s1112_s6, %s1112_s6 }
  0x33   : > { %p903_p5 = scmp.ne.s32.totalorder %s1112_s6, %s902_s28  ;;  %p911_p0 = scmp.lt.s32.totalorder %s902_s28, %s902_s28 }
  0x35   : > { %p905_p7 = pnand %p903_p5, %p863_p13  ;;  %p912_p1 = por %p911_p0, %p910_p12 }
  0x37   : > { %p906_p9 = pneg %p905_p7 }
  0x39   : > { %p913_p2 = pnand %p912_p1, %p906_p9 }
  0x3b   : > { %916 = shalt.err (!%p913_p2)
}
  0x3c   : > { %804 = dma.hbm_to_vmem [thread:$0]  (!%p1108_p11), %s1321_s3, 2048, %s1112_s6, [#allocation6], %s1021_s15, %s1021_s15, %s1022_s16  }
  0x3d   : > { %s1173_s29 = sadd.s32 1, %s1017_s21   ;;  %s29_s14 = sadd.s32 1, %s1013_s20 }
  0x3e   : > { %s26_s17 = ssub.s32 %s1017_s21, %s1173_s29  ;;  %p36_p13 = scmp.ne.s32.totalorder %s1013_s20, %s1009_s19 }
  0x3f   : > { %p27_p6 = scmp.eq.s32.totalorder %s26_s17, 0  ;;  %p37_p10 = scmp.eq.s32.totalorder %s1017_s21, 0 }
  0x40   : > { %p1331_p3 = scmp.eq.s32.totalorder %s1078_s22, 1  ;;  %p815_p7 = scmp.lt.s32.totalorder %s1017_s21, 2 }
  0x41   : > { %s1189_s27 = scalar_select %p27_p6, %s1013_s20, %s29_s14  }
  0x42   : > { %p1183_p5 = por %p1331_p3, %p36_p13  ;;  %p38_p9 = por %p37_p10, %p36_p13 }
  0x43   : > { %s208_s30 = sand.u32 1, %s1013_s20   ;;  %s614_s6 = sshll.u32 %s1017_s21, 8 }
  0x44   : > { %s1332_s23 = scalar_select %p1183_p5, 1, 0 }
  0x45   : > { %s599_s7 = sshll.u32 %s208_s30, 4  ;;  %s1196_s10 = scalar_lea.hbm %s1318_s0, %s614_s6 }
  0x46   : > { %s212_s11 = scalar_lea.vmem [#allocation2], %s599_s7  ;;  %p1200_p11 = pnand %p815_p7, %p38_p9 }
  0x47   : > { %s219_s28 = sshll.u32 %s212_s11, 4  ;;  %s1204_s13 = scalar_lea.sflag [#allocation3], %s208_s30  ;;  %s1198_s28 = int_to_ptr.vmem [resolvable:$true] %s219_s28 }
  0x48   : > { %s917_s14 = scalar_lea.hbm %s1196_s10, 256  ;;  %p919_p0 = pneg %p1200_p11 }
  0x49   : > { %p918_p12 = scmp.ne.s32.totalorder %s1196_s10, %s917_s14  ;;  %s922_s6 = scalar_lea.hbm %s1318_s0, 512 }
  0x4a   : > { %p923_p13 = scmp.lt.u32.totalorder %s1196_s10, %s1318_s0  ;;  %p924_p6 = scmp.lt.u32.totalorder %s922_s6, %s917_s14 }
  0x4b   : > { %p920_p1 = pnand %p919_p0, %p918_p12  ;;  %p926_p3 = scmp.lt.u32.totalorder %s917_s14, %s1196_s10 }
  0x4c   : > { %p925_p10 = por %p924_p6, %p923_p13 }
  0x4d   : > { %p921_p2 = pneg %p920_p1 }
  0x4e   : > { %p927_p7 = por %p926_p3, %p925_p10 }
  0x50   : > { %p928_p9 = pnand %p927_p7, %p921_p2 }
  0x52   : > { %931 = shalt.err (!%p928_p9)
}
  0x53   : > { %s932_s30 = scalar_lea.vmem %s1198_s28, 256  ;;  %s1023_s11 = smov [#allocation2]  }
  0x54   : > { %p933_p12 = scmp.ne.s32.totalorder %s1198_s28, %s932_s30  ;;  %s937_s17 = sshll.u32 %s1023_s11, 4  ;;  %s938_s17 = int_to_ptr.vmem [resolvable:$false] %s937_s17 }
  0x55   : > { %s939_s7 = scalar_lea.vmem %s938_s17, 512  ;;  %p940_p4 = scmp.lt.s32.totalorder %s1198_s28, %s938_s17 }
  0x56   : > { %p935_p1 = pnand %p933_p12, %p919_p0  ;;  %p941_p13 = scmp.lt.s32.totalorder %s939_s7, %s932_s30 }
  0x58   : > { %p936_p5 = pneg %p935_p1  ;;  %p942_p6 = por %p941_p13, %p940_p4 }
  0x5a   : > { %p943_p10 = pnand %p942_p6, %p936_p5 }
  0x5c   : > { %946 = shalt.err (!%p943_p10)
}
  0x5d   : > { %808 = dma.hbm_to_vmem [thread:$0]  (!%p1200_p11), %s1196_s10, 256, %s1198_s28, %s1204_s13, %s1021_s15, %s1021_s15, %s1022_s16  }
  0x5e   : > { %231 = sbr.rel (%p1097_p8) target bundleno = 605 (0x25d), region = 40  ;;  %s1238_s14 = sand.u32 (!%p1097_p8), 1, %s1009_s19  }
  0x5f   : > { %s603_s6 = sshll.u32 (!%p1097_p8), %s1238_s14, 4  ;;  %s234_s8 = scalar_lea.sflag (!%p1097_p8), [#allocation3], %s1238_s14 }
  0x60   : > { %s1244_s12 = scalar_lea.vmem (!%p1097_p8), [#allocation2], %s603_s6  ;;  %p1334_p4 = scmp.ne.s32.totalorder (!%p1097_p8), %s1327_s24, 0 }
  0x65   : > { %992 = dma.done.wait (%p1334_p4), %s234_s8, 256  }
  0x66   : > { %994 = vsyncadd (%p1334_p4), %s234_s8, 4294967040  ;;  %p1335_p5 = scmp.eq.s32.totalorder %s1078_s22, 0 }
  0x68   : > { %996 = dma.done.wait (%p1335_p5), [#allocation6], 4096   ;;  %p1336_p8 = pmov %p1335_p5 }
  0x69   : > { %v276_v0 = vld [vmem:[#allocation5] sm:$0xff]  ;;  %v277_v1 = vld [vmem:[#allocation5 + $0x8] sm:$0xff]  ;;  %v278_v2 = vld [vmem:[#allocation5 + $0x10] sm:$0xff]  ;;  %s271_s10 = scalar_lea.vmem [#allocation8], %s603_s6  ;;  %s615_s13 = sshll.u32 %s1078_s22, 8 }
  0x6a   : > { %998 = vsyncadd (%p1336_p8), [#allocation6], 4294963200  ;;  %v722_v3 = vpack.c.bf16 %v277_v1, %v276_v0  ;;  %v279_v4 = vld [vmem:[#allocation5 + $0x18] sm:$0xff]  ;;  %v280_v6 = vld [vmem:[#allocation5 + $0x20] sm:$0xff]  ;;  %s502_s28 = sshll.u32 %s271_s10, 4  ;;  %s1274_s11 = scalar_lea.hbm %s1323_s5, %s615_s13  ;;  %s1269_s28 = int_to_ptr.vmem [resolvable:$true] %s502_s28 }
  0x6b   : > { %v726_v5 = vpack.c.bf16 %v279_v4, %v278_v2  ;;  %v281_v7 = vld [vmem:[#allocation5 + $0x28] sm:$0xff]  ;;  %v282_v9 = vld [vmem:[#allocation5 + $0x30] sm:$0xff]  ;;  %v283_v10 = vld [vmem:[#allocation5 + $0x38] sm:$0xff]  ;;  %s489_s17 = scalar_lea.sflag [#allocation4], %s1238_s14  ;;  %s947_s7 = scalar_lea.vmem %s1269_s28, 256 }
  0x6c   : > { %723 = vmatprep.subr.bf16.mxu0 %v722_v3  ;;  %v730_v8 = vpack.c.bf16 %v281_v7, %v280_v6  ;;  %v1255_v11 = vld [vmem:[%s1244_s12] sm:$0xff]  ;;  %v385_v13 = vld [vmem:[#allocation7 + $0x8] sm:$0xff]  ;;  %v387_v16 = vld [vmem:[#allocation7 + $0x18] sm:$0xff]  ;;  %v734_v20 = vpack.c.bf16 %v283_v10, %v282_v9  ;;  %p948_p11 = scmp.ne.s32.totalorder %s1269_s28, %s947_s7  ;;  %p1337_p0 = scmp.ne.s32.totalorder %s1332_s23, 0 }
  0x6d   : > { %725 = vmatpush3.bf16.msra.mxu0 %v722_v3  ;;  %684 = vmatprep.mubr.f32.mxu0 %v1255_v11  ;;  %v384_v12 = vld [vmem:[#allocation7] sm:$0xff]  ;;  %v386_v14 = vld [vmem:[#allocation7 + $0x10] sm:$0xff]  ;;  %v389_v19 = vld [vmem:[#allocation7 + $0x28] sm:$0xff]  ;;  %v482_v3 = vmul.f32 0.5, %v1255_v11  ;;  %s1024_s22 = smov [#allocation8]  }
  0x6e   : > { %727 = vmatprep.subr.bf16.mxu0 %v726_v5  ;;  %v754_v15 = vpack.c.bf16 %v385_v13, %v384_v12  ;;  %v758_v17 = vpack.c.bf16 %v387_v16, %v386_v14  ;;  %v388_v18 = vld [vmem:[#allocation7 + $0x20] sm:$0xff]  ;;  %v285_v22 = vld [vmem:[#allocation5 + $0x48] sm:$0xff]  ;;  %v286_v25 = vld [vmem:[#allocation5 + $0x50] sm:$0xff]  ;;  %p949_p2 = pnand %p948_p11, %p1337_p0  ;;  %s951_s6 = sshll.u32 %s1024_s22, 4  ;;  %s952_s6 = int_to_ptr.vmem [resolvable:$false] %s951_s6 }
  0x6f   : > { %v284_v21 = vld [vmem:[#allocation5 + $0x40] sm:$0xff]  ;;  %v762_v23 = vpack.c.bf16 %v389_v19, %v388_v18  ;;  %v287_v26 = vld [vmem:[#allocation5 + $0x58] sm:$0xff]  ;;  %v289_v29 = vld [vmem:[#allocation5 + $0x68] sm:$0xff]  ;;  %s953_s8 = scalar_lea.vmem %s952_s6, 512  ;;  %p954_p7 = scmp.lt.s32.totalorder %s1269_s28, %s952_s6 }
  0x70   : > { %755 = vmatprep.subr.bf16.mxu1 %v754_v15  ;;  %v738_v24 = vpack.c.bf16 %v285_v22, %v284_v21  ;;  %v742_v27 = vpack.c.bf16 %v287_v26, %v286_v25  ;;  %v288_v28 = vld [vmem:[#allocation5 + $0x60] sm:$0xff]  ;;  %v290_v31 = vld [vmem:[#allocation5 + $0x70] sm:$0xff]  ;;  %v291_v32 = vld [vmem:[#allocation5 + $0x78] sm:$0xff]  ;;  %p950_p3 = pneg %p949_p2  ;;  %p955_p9 = scmp.lt.s32.totalorder %s953_s8, %s947_s7 }
  0x71   : > { %729 = vmatpush3.bf16.msra.mxu0 %v726_v5  ;;  %757 = vmatpush3.bf16.msra.mxu1 %v754_v15  ;;  %v746_v30 = vpack.c.bf16 %v289_v29, %v288_v28  ;;  %v750_v33 = vpack.c.bf16 %v291_v32, %v290_v31  ;;  %v275_v34 = vld [vmem:[%s1244_s12 + $0x8] sm:$0xff]  ;;  %v390_v35 = vld [vmem:[#allocation7 + $0x30] sm:$0xff]  ;;  %v392_v38 = vld [vmem:[#allocation7 + $0x40] sm:$0xff] }
  0x72   : > { %731 = vmatprep.subr.bf16.mxu0 %v730_v8  ;;  %759 = vmatprep.subr.bf16.mxu1 %v758_v17  ;;  %v391_v36 = vld [vmem:[#allocation7 + $0x38] sm:$0xff]  ;;  %v393_v39 = vld [vmem:[#allocation7 + $0x48] sm:$0xff]  ;;  %v394_v41 = vld [vmem:[#allocation7 + $0x50] sm:$0xff]  ;;  %v483_v2 = vmul.f32 0.5, %v275_v34  ;;  %p956_p12 = por %p955_p9, %p954_p7 }
  0x73   : > { %v766_v37 = vpack.c.bf16 %v391_v36, %v390_v35  ;;  %v770_v40 = vpack.c.bf16 %v393_v39, %v392_v38  ;;  %v395_v42 = vld [vmem:[#allocation7 + $0x58] sm:$0xff]  ;;  %v396_v44 = vld [vmem:[#allocation7 + $0x60] sm:$0xff]  ;;  %v397_v45 = vld [vmem:[#allocation7 + $0x68] sm:$0xff] }
  0x74   : > { %v774_v43 = vpack.c.bf16 %v395_v42, %v394_v41  ;;  %v778_v46 = vpack.c.bf16 %v397_v45, %v396_v44  ;;  %v398_v47 = vld [vmem:[#allocation7 + $0x70] sm:$0xff]  ;;  %v399_v48 = vld [vmem:[#allocation7 + $0x78] sm:$0xff]  ;;  %v607_v50 = vld [vmem:[%s1320_s2] ss:$0 sm:$0xff]  ;;  %p957_p1 = pnand %p956_p12, %p950_p3 }
  0x75   : > { %733 = vmatpush3.bf16.msra.mxu0 %v730_v8  ;;  %761 = vmatpush3.bf16.msra.mxu1 %v758_v17  ;;  %v782_v49 = vpack.c.bf16 %v399_v48, %v398_v47  ;;  %v608_v1 = vld [vmem:[%s1322_s4] ss:$0 sm:$0xff] }
  0x76   : > { %735 = vmatprep.subr.bf16.mxu0 %v734_v20  ;;  %763 = vmatprep.subr.bf16.mxu1 %v762_v23 }
  0x79   : > { %737 = vmatpush3.bf16.msra.mxu0 %v734_v20  ;;  %765 = vmatpush3.bf16.msra.mxu1 %v762_v23 }
  0x7a   : > { %739 = vmatprep.subr.bf16.mxu0 %v738_v24  ;;  %767 = vmatprep.subr.bf16.mxu1 %v766_v37 }
  0x7d   : > { %741 = vmatpush3.bf16.msra.mxu0 %v738_v24  ;;  %769 = vmatpush3.bf16.msra.mxu1 %v766_v37 }
  0x7e   : > { %743 = vmatprep.subr.bf16.mxu0 %v742_v27  ;;  %771 = vmatprep.subr.bf16.mxu1 %v770_v40 }
  0x81   : > { %745 = vmatpush3.bf16.msra.mxu0 %v742_v27  ;;  %773 = vmatpush3.bf16.msra.mxu1 %v770_v40 }
  0x82   : > { %747 = vmatprep.subr.bf16.mxu0 %v746_v30  ;;  %775 = vmatprep.subr.bf16.mxu1 %v774_v43 }
  0x85   : > { %749 = vmatpush3.bf16.msra.mxu0 %v746_v30  ;;  %777 = vmatpush3.bf16.msra.mxu1 %v774_v43 }
  0x86   : > { %751 = vmatprep.subr.bf16.mxu0 %v750_v33  ;;  %779 = vmatprep.subr.bf16.mxu1 %v778_v46 }
  0x89   : > { %753 = vmatpush3.bf16.msra.mxu0 %v750_v33  ;;  %781 = vmatpush3.bf16.msra.mxu1 %v778_v46 }
  0x8a   : > { %783 = vmatprep.subr.bf16.mxu1 %v782_v49 }
  0x8c   : > { %685 = vmatmul.mubr.f32.vlgmr.msra.gmra.mrb[0].mxu0 %v275_v34 }
  0x8d   : > { %785 = vmatpush3.bf16.msra.mxu1 %v782_v49 }
 0x15f   : > { %v686_v51 = vpop.f32.mrb[0].mxu0 }
 0x160   : > { %v371_v52 = vadd.f32 %v686_v51, %v607_v50  ;;  %v365_v53 = vpop.f32.mrb[1].mxu0 }
 0x161   : > { %v366_v54 = vadd.f32 %v607_v50, %v365_v53 }
 0x162   : > { %v377_v55 = vmul.f32 0.70710677, %v371_v52  ;;  %v375_v62 = vmul.f32 0.5, %v371_v52 }
 0x163   : > { %v376_v56 = vmul.f32 0.70710677, %v366_v54  ;;  %v374_v60 = vmul.f32 0.5, %v366_v54 }
 0x164   : > { %857 = verf.f32 %v377_v55 }
 0x165   : > { %859 = verf.f32 %v376_v56 }
 0x16e   : > { %v858_v57 = vpop.eup %857 }
 0x16f   : > { %v860_v58 = vpop.eup %859  ;;  %v381_v59 = vadd.f32 1.0, %v858_v57 }
 0x170   : > { %v380_v61 = vadd.f32 1.0, %v860_v58 }
 0x171   : > { %v383_v0 = vmul.f32 %v381_v59, %v375_v62 }
 0x172   : > { %v382_v63 = vmul.f32 %v380_v61, %v374_v60 }
 0x174   : > { %719 = vmatprep.mubr.f32.mxu1 %v382_v63 }
 0x175   : > { %720 = vmatmul.mubr.f32.vlgmr.msra.gmra.mrb[0].mxu1 %v383_v0 }
 0x248   : > { %v721_v4 = vpop.f32.mrb[0].mxu1 }
 0x249   : > { %v479_v5 = vadd.f32 %v721_v4, %v608_v1  ;;  %v473_v6 = vpop.f32.mrb[1].mxu1 }
 0x24a   : > { %v474_v7 = vadd.f32 %v608_v1, %v473_v6 }
 0x24b   : > { %v485_v8 = vadd.f32 %v483_v2, %v479_v5 }
 0x24c   : > { %v484_v9 = vadd.f32 %v482_v3, %v474_v7 }
 0x24d   : > { %487 = vst [vmem:[%s271_s10 + $0x8] sm:$0xff] %v485_v8 }
 0x24e   : > { %486 = vst [vmem:[%s271_s10] sm:$0xff] %v484_v9 }
 0x24f   : > { %960 = shalt.err (!%p957_p1)
}
 0x250   : > { %s961_s12 = scalar_lea.hbm %s1274_s11, 256  ;;  %s965_s15 = scalar_lea.hbm %s1323_s5, 512 }
 0x251   : > { %p962_p13 = scmp.ne.s32.totalorder %s1274_s11, %s961_s12  ;;  %p966_p4 = scmp.lt.u32.totalorder %s1274_s11, %s1323_s5 }
 0x252   : > { %p967_p5 = scmp.lt.u32.totalorder %s965_s15, %s961_s12  ;;  %p969_p11 = scmp.lt.u32.totalorder %s961_s12, %s1274_s11 }
 0x253   : > { %p963_p6 = pnand %p962_p13, %p1337_p0 }
 0x254   : > { %p968_p8 = por %p967_p5, %p966_p4 }
 0x255   : > { %p964_p10 = pneg %p963_p6 }
 0x256   : > { %p970_p2 = por %p969_p11, %p968_p8 }
 0x258   : > { %p971_p3 = pnand %p970_p2, %p964_p10 }
 0x25a   : > { %974 = shalt.err (!%p971_p3)
}
 0x25b   : > { %s1025_s13 = smov 128   ;;  %s1026_s9 = smov 8  }
 0x25c   : > { %796 = dma.vmem_to_hbm [thread:$0]  (%p1337_p0), %s1269_s28, 256, %s1274_s11, %s489_s17, %s1025_s13, %s1025_s13, %s1026_s9  }
 0x25d PF: > { %s517_s30 = sand.u32 1, %s1005_s18   ;;  %p1338_p7 = scmp.ne.s32.totalorder %s1328_s25, 0 }
 0x25e   : > { %p1339_p9 = scmp.ge.s32.totalorder %s1017_s21, 2  ;;  %s518_s7 = scalar_lea.sflag [#allocation4], %s517_s30 }
 0x260   : > { %p810_p12 = pnand %p1339_p9, %p1338_p7 }
 0x262   : > { %1000 = dma.done.wait (!%p810_p12), %s518_s7, 256  }
 0x263   : > { %1002 = vsyncadd (!%p810_p12), %s518_s7, 4294967040  ;;  %p19_p1 = scmp.ge.s32.totalorder %s1173_s29, 4   ;;  %s1340_s18 = smov %s1009_s19 }
 0x264   : > { %s1341_s19 = smov %s1013_s20  ;;  %s1342_s20 = smov %s1189_s27 }
 0x265   : > { %s1343_s21 = smov %s1173_s29  ;;  %21 = sbr.rel (!%p19_p1) target bundleno = 6 (0x6), region = 93 }
 0x26c   :  { %523 = vsyncpa [#allocation3], 1 }
 0x26d   :  { %525 = vsyncpa [#allocation3 + $0x1], 1 }
 0x26e   :  { %526 = vsyncpa [#allocation6], 1 }
 0x26f   :  { %527 = vsyncpa [#allocation4], 1 }
 0x270   :  { %529 = vsyncpa [#allocation4 + $0x1], 1 }

</bundles_post_ra>
